<compile_context>
chip_gen: v5e
topology: v5e:2x2
jax: 0.10.0
libtpu: 0.0.40
codegen_flags: <defaults>
</compile_context>

<pallas_src>
import jax
import jax.numpy as jnp
from jax.experimental import pallas as pl
from jax.experimental.pallas import tpu as pltpu


def _round_down(x, m):
    return (x // m) * m


def slp_kernel(x_ref, w_ref, b_ref, o_ref):
    # Linear: (TB, D) @ (D, L) -> MXU matmul with f32 accumulation.
    s = jnp.dot(x_ref[...], w_ref[...], preferred_element_type=jnp.float32)
    s = s + b_ref[...].astype(jnp.float32)
    # log_softmax along dim=1 (last axis), numerically stable.
    m = jnp.max(s, axis=-1, keepdims=True)
    z = s - m
    lse = jnp.log(jnp.sum(jnp.exp(z), axis=-1, keepdims=True))
    o_ref[...] = (z - lse).astype(o_ref.dtype)


def _pick_batch_tile(D, itemsize, *, x_stream_budget_bytes=8 << 20, tile_cap=2048):
    """Largest batch tile (multiple of 8) whose double-buffered x stream fits the budget."""
    tb = _round_down(x_stream_budget_bytes // (2 * D * itemsize), 8)
    return max(8, min(tb, tile_cap))


def slp_forward(x, w, b, input_size, *, compute_dtype=jnp.bfloat16, tile_b=None):
    """x: any shape with B * input_size total elements (torch .view(-1, input_size)).
    w: (input_size, logits)   (transposed vs. torch's (logits, input_size))
    b: (logits,)
    compute_dtype: dtype of the x/W HBM stream (default bf16; accumulation, bias
                   add and log_softmax stay in f32).  None keeps the input dtype.
    """
    xb = x.reshape(-1, input_size)  # torch .view(-1, input_size)
    B, D = xb.shape
    L = w.shape[1]

    if compute_dtype is not None and xb.dtype != compute_dtype:
        xb = xb.astype(compute_dtype)
    if compute_dtype is not None and w.dtype != compute_dtype:
        w = w.astype(compute_dtype)
    b2 = b.reshape(1, L).astype(jnp.float32)

    cap = tile_b if tile_b is not None else _pick_batch_tile(D, xb.dtype.itemsize)
    if B <= cap:
        TB = B       # single full-dim block: always layout-legal, no ragged edge
    else:
        TB = cap     # multiple of 8; Pallas masks the ragged last block on writeback
    grid = (pl.cdiv(B, TB),)

    cost = pl.CostEstimate(
        flops=2 * B * D * L,
        transcendentals=B * (L + 1),  # exp per logit + one log per row
        bytes_accessed=(B * D * xb.dtype.itemsize + D * L * w.dtype.itemsize
                        + L * 4 + B * L * 4),
    )

    return pl.pallas_call(
        slp_kernel,
        out_shape=jax.ShapeDtypeStruct((B, L), jnp.float32),
        grid=grid,
        in_specs=[
            pl.BlockSpec((TB, D), lambda i: (i, 0)),   # streamed, double-buffered
            pl.BlockSpec((D, L), lambda i: (0, 0)),    # resident in VMEM
            pl.BlockSpec((1, L), lambda i: (0, 0)),    # resident in VMEM
        ],
        out_specs=pl.BlockSpec((TB, L), lambda i: (i, 0)),
        compiler_params=pltpu.CompilerParams(
            dimension_semantics=("parallel",),          # megacore sharding on v7x
        ),
        cost_estimate=cost,
    )(xb, w, b2)


def reference_forward(x, w, b, input_size):
    xb = x.reshape(-1, input_size)
    s = xb @ w + b[None, :]
    return jax.nn.log_softmax(s, axis=1)


if __name__ == "__main__":
    # Small shapes consistent with the module: input is NCHW (2, 4, 16, 16),
    # so input_size = 4 * 16 * 16 = 1024; logits = 10 (MNIST-like).
    B, C, H, W = 2, 4, 16, 16
    input_size = C * H * W
    logits = 10

    key = jax.random.PRNGKey(0)
    kx, kw, kb = jax.random.split(key, 3)

    x = jax.random.normal(kx, (B, C, H, W), dtype=jnp.float32)

    # Deterministic parameter init (PyTorch Linear default: U(-1/sqrt(D), 1/sqrt(D)))
    bound = 1.0 / (input_size ** 0.5)
    w = jax.random.uniform(kw, (input_size, logits), jnp.float32, -bound, bound)
    b = jax.random.uniform(kb, (logits,), jnp.float32, -bound, bound)

    # Default path: bf16 x/W stream, f32 accumulate + log_softmax.
    out = slp_forward(x, w, b, input_size)
    out = jax.block_until_ready(out)
    assert out.shape == (B, logits)
    ref_bf16 = reference_forward(
        x.astype(jnp.bfloat16).astype(jnp.float32),
        w.astype(jnp.bfloat16).astype(jnp.float32), b, input_size)
    assert jnp.allclose(out, ref_bf16, atol=1e-3, rtol=1e-3), "bf16-path mismatch vs reference"

    # f32 path: strict check against the f32 reference.
    out32 = slp_forward(x, w, b, input_size, compute_dtype=jnp.float32)
    out32 = jax.block_until_ready(out32)
    ref32 = reference_forward(x, w, b, input_size)
    assert jnp.allclose(out32, ref32, atol=1e-5, rtol=1e-5), "f32-path mismatch vs reference"

    print("KERNEL_OK")
</pallas_src>

<mosaic_0001>
module attributes {stable_mosaic.version = 11 : i64} {
  func.func @slp_kernel(%arg0: i32, %arg1: memref<2x1024xbf16, #tpu.memory_space<vmem>>, %arg2: memref<1024x10xbf16, #tpu.memory_space<vmem>>, %arg3: memref<1x10xf32, #tpu.memory_space<vmem>>, %arg4: memref<2x10xf32, #tpu.memory_space<vmem>>) attributes {dimension_semantics = [#tpu.dimension_semantics<parallel>], iteration_bounds = array<i64: 1>, scalar_prefetch = 0 : i64, scratch_operands = 0 : i64, tpu.core_type = #tpu.core_type<tc>, window_params = [{transform_indices = @transform_0, window_bounds = array<i64: 2, 1024>}, {pipeline_mode = #tpu.pipeline_mode<synchronous>, transform_indices = @transform_1, window_bounds = array<i64: 1024, 10>}, {pipeline_mode = #tpu.pipeline_mode<synchronous>, transform_indices = @transform_2, window_bounds = array<i64: 1, 10>}, {transform_indices = @transform_3, window_bounds = array<i64: 2, 10>}]} {
    %c0 = arith.constant 0 : index
    %c0_0 = arith.constant 0 : index
    %0 = vector.load %arg1[%c0, %c0_0] : memref<2x1024xbf16, #tpu.memory_space<vmem>>, vector<2x1024xbf16>
    %c0_1 = arith.constant 0 : index
    %c0_2 = arith.constant 0 : index
    %1 = vector.load %arg2[%c0_1, %c0_2] : memref<1024x10xbf16, #tpu.memory_space<vmem>>, vector<1024x10xbf16>
    %cst = arith.constant dense<0.000000e+00> : vector<2x10xf32>
    %2 = tpu.matmul %0, %1, %cst {dimension_numbers = #tpu.dot_dimension_numbers<[1], [0], [0], [1], [0, 0, 1, 1], [], []>} : vector<2x1024xbf16>, vector<1024x10xbf16>, vector<2x10xf32> -> vector<2x10xf32>
    %c0_3 = arith.constant 0 : index
    %c0_4 = arith.constant 0 : index
    %3 = vector.load %arg3[%c0_3, %c0_4] : memref<1x10xf32, #tpu.memory_space<vmem>>, vector<1x10xf32>
    %4 = vector.broadcast %3 : vector<1x10xf32> to vector<2x10xf32>
    %5 = arith.addf %2, %4 : vector<2x10xf32>
    %cst_5 = arith.constant dense<0xFF800000> : vector<2xf32>
    %6 = vector.multi_reduction <maximumf>, %5, %cst_5 [1] : vector<2x10xf32> to vector<2xf32>
    %7 = vector.shape_cast %6 : vector<2xf32> to vector<2x1xf32>
    %8 = vector.broadcast %7 : vector<2x1xf32> to vector<2x10xf32>
    %9 = arith.subf %5, %8 : vector<2x10xf32>
    %10 = math.exp %9 : vector<2x10xf32>
    %cst_6 = arith.constant dense<0.000000e+00> : vector<2xf32>
    %11 = vector.multi_reduction <add>, %10, %cst_6 [1] : vector<2x10xf32> to vector<2xf32>
    %12 = vector.shape_cast %11 : vector<2xf32> to vector<2x1xf32>
    %13 = math.log %12 : vector<2x1xf32>
    %14 = vector.broadcast %13 : vector<2x1xf32> to vector<2x10xf32>
    %15 = arith.subf %9, %14 : vector<2x10xf32>
    %c0_7 = arith.constant 0 : index
    %c0_8 = arith.constant 0 : index
    %16 = vector.load %arg4[%c0_7, %c0_8] : memref<2x10xf32, #tpu.memory_space<vmem>>, vector<2x10xf32>
    tpu.vector_store %arg4[%c0_7, %c0_8], %15 {strides = array<i32>} : memref<2x10xf32, #tpu.memory_space<vmem>>, vector<2x10xf32>,
    return
  }
  func.func @transform_0(%arg0: i32) -> (i32, i32) {
    %c0_i32 = arith.constant 0 : i32
    %c0_i32_0 = arith.constant 0 : i32
    return %arg0, %c0_i32 : i32, i32
  }
  func.func @transform_1(%arg0: i32) -> (i32, i32) {
    %c0_i32 = arith.constant 0 : i32
    %c0_i32_0 = arith.constant 0 : i32
    %c0_i32_1 = arith.constant 0 : i32
    return %c0_i32, %c0_i32_0 : i32, i32
  }
  func.func @transform_2(%arg0: i32) -> (i32, i32) {
    %c0_i32 = arith.constant 0 : i32
    %c0_i32_0 = arith.constant 0 : i32
    %c0_i32_1 = arith.constant 0 : i32
    return %c0_i32, %c0_i32_0 : i32, i32
  }
  func.func @transform_3(%arg0: i32) -> (i32, i32) {
    %c0_i32 = arith.constant 0 : i32
    %c0_i32_0 = arith.constant 0 : i32
    return %arg0, %c0_i32 : i32, i32
  }
}

</mosaic_0001>

<bundles_post_ra>
// kernel: tpu_custom_call.1
= control target key start
LH: loop header
LB: loop body
LE: loop exit
PB: predicated region body
PF: predicated region fallthrough
CT: control target
= control target key end

     0   :  { %s1261_s0 = inlined_call_operand.vmem [shape: bf16[2,1024], index: 0, kind: input, shape index: {}]   ;;  %s1262_s1 = inlined_call_operand.vmem [shape: bf16[1024,10], index: 1, kind: input, shape index: {}]   ;;  %s1263_s2 = inlined_call_operand.vmem [shape: f32[1,10], index: 2, kind: input, shape index: {}]   ;;  %s1264_s3 = inlined_call_operand.hbm [shape: f32[2,10], index: 3, kind: output, shape index: {}]  }
   0x1   :  { %v947_v0 = vld [vmem:[%s1262_s1 + $0x38] sm:$0xff]  ;;  %v946_v4 = vld [vmem:[%s1262_s1 + $0x30] sm:$0xff]  ;;  %v945_v8 = vld [vmem:[%s1262_s1 + $0x28] sm:$0xff] }
   0x2   :  { %v955_v1 = vld [vmem:[%s1262_s1 + $0x78] sm:$0xff]  ;;  %550 = vmatpush.bf16.msra.mxu0 %v947_v0  ;;  %v954_v5 = vld [vmem:[%s1262_s1 + $0x70] sm:$0xff]  ;;  %v953_v9 = vld [vmem:[%s1262_s1 + $0x68] sm:$0xff] }
   0x3   :  { %v963_v2 = vld [vmem:[%s1262_s1 + $0xb8] sm:$0xff]  ;;  %563 = vmatpush.bf16.msra.mxu1 %v955_v1  ;;  %v962_v6 = vld [vmem:[%s1262_s1 + $0xb0] sm:$0xff]  ;;  %v961_v10 = vld [vmem:[%s1262_s1 + $0xa8] sm:$0xff] }
   0x4   :  { %v971_v3 = vld [vmem:[%s1262_s1 + $0xf8] sm:$0xff]  ;;  %576 = vmatpush.bf16.msra.mxu2 %v963_v2  ;;  %v970_v7 = vld [vmem:[%s1262_s1 + $0xf0] sm:$0xff]  ;;  %v969_v11 = vld [vmem:[%s1262_s1 + $0xe8] sm:$0xff] }
   0x5   :  { %589 = vmatpush.bf16.msra.mxu3 %v971_v3  ;;  %v944_v12 = vld [vmem:[%s1262_s1 + $0x20] sm:$0xff]  ;;  %v943_v17 = vld [vmem:[%s1262_s1 + $0x18] sm:$0xff]  ;;  %v942_v21 = vld [vmem:[%s1262_s1 + $0x10] sm:$0xff] }
   0x6   :  { %551 = vmatpush.bf16.msra.mxu0 %v946_v4  ;;  %v952_v13 = vld [vmem:[%s1262_s1 + $0x60] sm:$0xff]  ;;  %v951_v18 = vld [vmem:[%s1262_s1 + $0x58] sm:$0xff]  ;;  %v950_v22 = vld [vmem:[%s1262_s1 + $0x50] sm:$0xff] }
   0x7   :  { %564 = vmatpush.bf16.msra.mxu1 %v954_v5  ;;  %v960_v14 = vld [vmem:[%s1262_s1 + $0xa0] sm:$0xff]  ;;  %v959_v19 = vld [vmem:[%s1262_s1 + $0x98] sm:$0xff] }
   0x8   :  { %577 = vmatpush.bf16.msra.mxu2 %v962_v6  ;;  %v968_v15 = vld [vmem:[%s1262_s1 + $0xe0] sm:$0xff]  ;;  %v967_v20 = vld [vmem:[%s1262_s1 + $0xd8] sm:$0xff] }
   0x9   :  { %590 = vmatpush.bf16.msra.mxu3 %v970_v7  ;;  %v15_v16 = vld [vmem:[%s1261_s0] sm:$0xff] }
   0xa   :  { %552 = vmatpush.bf16.msra.mxu0 %v945_v8  ;;  %149 = vst [vmem:[#allocation1] ss:$9 sm:$0xff] %v15_v16 }
   0xb   :  { %565 = vmatpush.bf16.msra.mxu1 %v953_v9 }
   0xc   :  { %578 = vmatpush.bf16.msra.mxu2 %v961_v10 }
   0xd   :  { %591 = vmatpush.bf16.msra.mxu3 %v969_v11 }
   0xe   :  { %553 = vmatpush.bf16.msra.mxu0 %v944_v12 }
   0xf   :  { %566 = vmatpush.bf16.msra.mxu1 %v952_v13 }
  0x10   :  { %579 = vmatpush.bf16.msra.mxu2 %v960_v14 }
  0x11   :  { %592 = vmatpush.bf16.msra.mxu3 %v968_v15 }
  0x12   :  { %554 = vmatpush.bf16.msra.mxu0 %v943_v17 }
  0x13   :  { %567 = vmatpush.bf16.msra.mxu1 %v951_v18 }
  0x14   :  { %8 = vsyncpa [#allocation3], 0  ;;  %580 = vmatpush.bf16.msra.mxu2 %v959_v19  ;;  %v958_v23 = vld [vmem:[%s1262_s1 + $0x90] sm:$0xff]  ;;  %v941_v25 = vld [vmem:[%s1262_s1 + $0x8] sm:$0xff]  ;;  %vm654_vm0 = vcmask 74752   ;;  %s675_s7 = sshll.u32 %s1264_s3, 4  ;;  %s676_s7 = int_to_ptr.hbm [resolvable:$true] %s675_s7 }
  0x15   :  { %593 = vmatpush.bf16.msra.mxu3 %v967_v20  ;;  %v966_v24 = vld [vmem:[%s1262_s1 + $0xd0] sm:$0xff]  ;;  %v949_v26 = vld [vmem:[%s1262_s1 + $0x48] sm:$0xff]  ;;  %v940_v29 = vld [vmem:[%s1262_s1] sm:$0xff] }
  0x16   :  { %555 = vmatpush.bf16.msra.mxu0 %v942_v21  ;;  %v957_v27 = vld [vmem:[%s1262_s1 + $0x88] sm:$0xff]  ;;  %v948_v30 = vld [vmem:[%s1262_s1 + $0x40] sm:$0xff]  ;;  %v979_v33 = vld [vmem:[%s1262_s1 + $0x138] sm:$0xff] }
  0x17   :  { %568 = vmatpush.bf16.msra.mxu1 %v950_v22  ;;  %v965_v28 = vld [vmem:[%s1262_s1 + $0xc8] sm:$0xff]  ;;  %v956_v31 = vld [vmem:[%s1262_s1 + $0x80] sm:$0xff]  ;;  %v987_v34 = vld [vmem:[%s1262_s1 + $0x178] sm:$0xff] }
  0x18   :  { %581 = vmatpush.bf16.msra.mxu2 %v958_v23  ;;  %v964_v32 = vld [vmem:[%s1262_s1 + $0xc0] sm:$0xff]  ;;  %v995_v35 = vld [vmem:[%s1262_s1 + $0x1b8] sm:$0xff]  ;;  %v978_v37 = vld [vmem:[%s1262_s1 + $0x130] sm:$0xff] }
  0x19   :  { %594 = vmatpush.bf16.msra.mxu3 %v966_v24  ;;  %v1003_v36 = vld [vmem:[%s1262_s1 + $0x1f8] sm:$0xff]  ;;  %v150_v39 = vld [vmem:[#allocation1] sm:$0xff]  ;;  %v986_v40 = vld [vmem:[%s1262_s1 + $0x170] sm:$0xff] }
  0x1a   :  { %556 = vmatpush.bf16.msra.mxu0 %v941_v25  ;;  %v152_v38 = vld [vmem:[#allocation1 + $0x12] sm:$0xff]  ;;  %v153_v41 = vld [vmem:[#allocation1 + $0x1b] sm:$0xff]  ;;  %v151_v42 = vld [vmem:[#allocation1 + $0x9] sm:$0xff] }
  0x1b   :  { %569 = vmatpush.bf16.msra.mxu1 %v949_v26  ;;  %v994_v43 = vld [vmem:[%s1262_s1 + $0x1b0] sm:$0xff]  ;;  %v977_v45 = vld [vmem:[%s1262_s1 + $0x128] sm:$0xff]  ;;  %v976_v49 = vld [vmem:[%s1262_s1 + $0x120] sm:$0xff] }
  0x1c   :  { %582 = vmatpush.bf16.msra.mxu2 %v957_v27  ;;  %v1002_v44 = vld [vmem:[%s1262_s1 + $0x1f0] sm:$0xff]  ;;  %v985_v46 = vld [vmem:[%s1262_s1 + $0x168] sm:$0xff]  ;;  %v984_v50 = vld [vmem:[%s1262_s1 + $0x160] sm:$0xff] }
  0x1d   :  { %595 = vmatpush.bf16.msra.mxu3 %v965_v28  ;;  %v993_v47 = vld [vmem:[%s1262_s1 + $0x1a8] sm:$0xff]  ;;  %v992_v51 = vld [vmem:[%s1262_s1 + $0x1a0] sm:$0xff]  ;;  %v975_v53 = vld [vmem:[%s1262_s1 + $0x118] sm:$0xff] }
  0x1e   :  { %557 = vmatpush.bf16.msra.mxu0 %v940_v29  ;;  %v1001_v48 = vld [vmem:[%s1262_s1 + $0x1e8] sm:$0xff]  ;;  %v1000_v52 = vld [vmem:[%s1262_s1 + $0x1e0] sm:$0xff]  ;;  %v983_v54 = vld [vmem:[%s1262_s1 + $0x158] sm:$0xff] }
  0x1f   :  { %570 = vmatpush.bf16.msra.mxu1 %v948_v30  ;;  %v991_v55 = vld [vmem:[%s1262_s1 + $0x198] sm:$0xff]  ;;  %v974_v57 = vld [vmem:[%s1262_s1 + $0x110] sm:$0xff]  ;;  %v973_v61 = vld [vmem:[%s1262_s1 + $0x108] sm:$0xff] }
  0x20   :  { %583 = vmatpush.bf16.msra.mxu2 %v956_v31  ;;  %v999_v56 = vld [vmem:[%s1262_s1 + $0x1d8] sm:$0xff]  ;;  %v982_v58 = vld [vmem:[%s1262_s1 + $0x150] sm:$0xff]  ;;  %v981_v62 = vld [vmem:[%s1262_s1 + $0x148] sm:$0xff] }
  0x21   :  { %596 = vmatpush.bf16.msra.mxu3 %v964_v32  ;;  %558 = vmatmul.bf16.vlgmr.msra.gmra.mxu0 %v150_v39  ;;  %v990_v59 = vld [vmem:[%s1262_s1 + $0x190] sm:$0xff]  ;;  %v989_v63 = vld [vmem:[%s1262_s1 + $0x188] sm:$0xff]  ;;  %v972_v1 = vld [vmem:[%s1262_s1 + $0x100] sm:$0xff] }
  0x22   :  { %602 = vmatpush.bf16.msrb.mxu0 %v979_v33  ;;  %571 = vmatmul.bf16.vlgmr.msra.gmra.mxu1 %v151_v42  ;;  %v998_v60 = vld [vmem:[%s1262_s1 + $0x1d0] sm:$0xff]  ;;  %v997_v0 = vld [vmem:[%s1262_s1 + $0x1c8] sm:$0xff]  ;;  %v980_v2 = vld [vmem:[%s1262_s1 + $0x140] sm:$0xff] }
  0x23   :  { %615 = vmatpush.bf16.msrb.mxu1 %v987_v34  ;;  %584 = vmatmul.bf16.vlgmr.msra.gmra.mxu2 %v152_v38  ;;  %v988_v3 = vld [vmem:[%s1262_s1 + $0x180] sm:$0xff]  ;;  %v155_v6 = vld [vmem:[#allocation1 + $0x2d] sm:$0xff]  ;;  %v156_v7 = vld [vmem:[#allocation1 + $0x36] sm:$0xff] }
  0x24   :  { %628 = vmatpush.bf16.msrb.mxu2 %v995_v35  ;;  %597 = vmatmul.bf16.vlgmr.msra.gmra.mxu3 %v153_v41  ;;  %v996_v4 = vld [vmem:[%s1262_s1 + $0x1c0] sm:$0xff] }
  0x25   :  { %641 = vmatpush.bf16.msrb.mxu3 %v1003_v36  ;;  %v154_v5 = vld [vmem:[#allocation1 + $0x24] sm:$0xff]  ;;  %v1005_v15 = vld [vmem:[%s1263_s2] ss:$0 sm:$0xff]  ;;  %s1036_s2 = smov [#allocation2]  }
  0x26   :  { %603 = vmatpush.bf16.msrb.mxu0 %v978_v37  ;;  %v157_v8 = vld [vmem:[#allocation1 + $0x3f] sm:$0xff]  ;;  %s673_s4 = sshll.u32 %s1036_s2, 4  ;;  %s674_s4 = int_to_ptr.vmem [resolvable:$true] %s673_s4 }
  0x27   :  { %616 = vmatpush.bf16.msrb.mxu1 %v986_v40 }
  0x28   :  { %629 = vmatpush.bf16.msrb.mxu2 %v994_v43 }
  0x29   :  { %642 = vmatpush.bf16.msrb.mxu3 %v1002_v44 }
  0x2a   :  { %604 = vmatpush.bf16.msrb.mxu0 %v977_v45 }
  0x2b   :  { %617 = vmatpush.bf16.msrb.mxu1 %v985_v46 }
  0x2c   :  { %630 = vmatpush.bf16.msrb.mxu2 %v993_v47 }
  0x2d   :  { %643 = vmatpush.bf16.msrb.mxu3 %v1001_v48 }
  0x2e   :  { %605 = vmatpush.bf16.msrb.mxu0 %v976_v49 }
  0x2f   :  { %618 = vmatpush.bf16.msrb.mxu1 %v984_v50 }
  0x30   :  { %631 = vmatpush.bf16.msrb.mxu2 %v992_v51 }
  0x31   :  { %644 = vmatpush.bf16.msrb.mxu3 %v1000_v52 }
  0x32   :  { %606 = vmatpush.bf16.msrb.mxu0 %v975_v53 }
  0x33   :  { %619 = vmatpush.bf16.msrb.mxu1 %v983_v54 }
  0x34   :  { %632 = vmatpush.bf16.msrb.mxu2 %v991_v55 }
  0x35   :  { %645 = vmatpush.bf16.msrb.mxu3 %v999_v56 }
  0x36   :  { %607 = vmatpush.bf16.msrb.mxu0 %v974_v57 }
  0x37   :  { %620 = vmatpush.bf16.msrb.mxu1 %v982_v58 }
  0x38   :  { %633 = vmatpush.bf16.msrb.mxu2 %v990_v59 }
  0x39   :  { %646 = vmatpush.bf16.msrb.mxu3 %v998_v60 }
  0x3a   :  { %608 = vmatpush.bf16.msrb.mxu0 %v973_v61 }
  0x3b   :  { %621 = vmatpush.bf16.msrb.mxu1 %v981_v62 }
  0x3c   :  { %634 = vmatpush.bf16.msrb.mxu2 %v989_v63 }
  0x3d   :  { %647 = vmatpush.bf16.msrb.mxu3 %v997_v0 }
  0x3e   :  { %609 = vmatpush.bf16.msrb.mxu0 %v972_v1 }
  0x3f   :  { %622 = vmatpush.bf16.msrb.mxu1 %v980_v2 }
  0x40   :  { %635 = vmatpush.bf16.msrb.mxu2 %v988_v3 }
  0x41   :  { %648 = vmatpush.bf16.msrb.mxu3 %v996_v4  ;;  %610 = vmatmul.bf16.vlgmr.msrb.gmra.mxu0 %v154_v5 }
  0x42   :  { %623 = vmatmul.bf16.vlgmr.msrb.gmra.mxu1 %v155_v6 }
  0x43   :  { %636 = vmatmul.bf16.vlgmr.msrb.gmra.mxu2 %v156_v7 }
  0x44   :  { %649 = vmatmul.bf16.vlgmr.msrb.gmra.mxu3 %v157_v8 }
  0x9e   :  { %v559_v9 = vpop.f32.mrf.mxu0 }
  0x9f   :  { %v572_v10 = vpop.f32.mrf.mxu1  ;;  %v560_v18 = vadd.f32 %v1005_v15, %v559_v9 }
  0xa1   :  { %v573_v19 = vadd.f32 %v572_v10, %v560_v18 }
  0xa6   :  { %v585_v11 = vpop.f32.mrf.mxu2  ;;  %v561_v13 = vpop.f32.mrf.mxu0 }
  0xa7   :  { %v598_v12 = vpop.f32.mrf.mxu3  ;;  %v574_v14 = vpop.f32.mrf.mxu1  ;;  %v586_v20 = vadd.f32 %v585_v11, %v573_v19 }
  0xa9   :  { %v599_v21 = vadd.f32 %v598_v12, %v586_v20 }
  0xae   :  { %v587_v16 = vpop.f32.mrf.mxu2 }
  0xaf   :  { %v600_v17 = vpop.f32.mrf.mxu3 }
  0xbe   :  { %v611_v22 = vpop.f32.mrf.mxu0 }
  0xbf   :  { %v624_v23 = vpop.f32.mrf.mxu1  ;;  %v612_v24 = vadd.f32 %v611_v22, %v599_v21 }
  0xc1   :  { %v625_v25 = vadd.f32 %v624_v23, %v612_v24 }
  0xc6   :  { %v637_v26 = vpop.f32.mrf.mxu2  ;;  %v613_v29 = vpop.f32.mrf.mxu0 }
  0xc7   :  { %v650_v27 = vpop.f32.mrf.mxu3  ;;  %v638_v28 = vadd.f32 %v637_v26, %v625_v25  ;;  %v626_v30 = vpop.f32.mrf.mxu1 }
  0xc9   :  { %v651_v31 = vadd.f32 %v650_v27, %v638_v28 }
  0xcb   :  { %v655_v32 = vsel %vm654_vm0, %v651_v31, -inf }
  0xcc   :  { %656 = vmax.xlane.f32.xlu0 %v655_v32 }
  0xce   :  { %v639_v33 = vpop.f32.mrf.mxu2 }
  0xcf   :  { %v652_v34 = vpop.f32.mrf.mxu3 }
 0x13f   :  { %v657_v35 = vpop.xlane.xlu0 %656 }
 0x140   :  { %v658_v36 = vsub.f32 %v651_v31, %v657_v35 }
 0x142   :  { %v659_v37 = vmul.f32 1.442695, %v658_v36 }
 0x144   :  { %1006 = vpow2.f32 %v659_v37 }
 0x14a   :  { %v1007_v38 = vpop.eup %1006 }
 0x14b   :  { %v661_v39 = vsel %vm654_vm0, %v1007_v38, 0.0 }
 0x14c   :  { %662 = vadd.xlane.f32.xlu0 %v661_v39 }
 0x1bf   :  { %v663_v40 = vpop.xlane.xlu0 %662 }
 0x1c0   :  { %1008 = vlog2.f32 %v663_v40 }
 0x1c6   :  { %v1009_v41 = vpop.eup %1008 }
 0x1c7   :  { %v665_v42 = vmul.f32 0.6931472, %v1009_v41 }
 0x1c9   :  { %v666_v43 = vsub.f32 %v658_v36, %v665_v42 }
 0x1cb   :  { %667 = vst.msk [vmem:[#allocation2] sm:$0x3] %vm654_vm0, %v666_v43 }
 0x1cc   :  { %678 = dma.vmem_to_hbm [thread:$0]  %s674_s4, 32, %s676_s7, [#allocation3]  }
 0x1cd   :  { %1034 = dma.done.wait [#allocation3], 32  }
 0x1ce   :  { %1035 = vsyncadd [#allocation3], 4294967264 }
 0x1cf   :  { %683 = vsyncpa [#allocation3], 1 }

</bundles_post_ra>
